<compile_context>
chip_gen: v5e
topology: v5e:2x2
jax: 0.10.0
libtpu: 0.0.40
codegen_flags: <defaults>
</compile_context>

<pallas_src>
import functools

import jax
import jax.numpy as jnp
from jax import lax
from jax.experimental import pallas as pl
from jax.experimental.pallas import tpu as pltpu


def _round_up(x, m):
    return (x + m - 1) // m * m


def _self_attention_kernel(x_ref, wqkv_ref, bqkv_ref, wo_ref, bo_ref, o_ref,
                           *, a, b_s, compute_dtype):
    """Single-tile body.  All operands are VMEM-resident; weights arrive
    already padded, fused, cast to compute_dtype, with 1/sqrt(k_dim) folded
    into the K slice of the fused weight."""
    B, A = o_ref.shape                    # padded (sublane, lane-dense) dims

    # Fused Q/K/V projection: one MXU pass over a (A, 3A) weight.  x and the
    # weight are already compute_dtype; accumulation is f32; bias is f32.
    qkv = jnp.dot(x_ref[...], wqkv_ref[...],
                  preferred_element_type=jnp.float32) + bqkv_ref[...]
    q = qkv[:, 0 * A:1 * A]
    k = qkv[:, 1 * A:2 * A]
    v = qkv[:, 2 * A:3 * A]

    # Padded batch rows (b >= b_s): x rows are zero, but the projection bias
    # leaks into them.  Zeroing k's padded rows annihilates the spurious
    # bk_i * bq_j terms in the batch-axis contraction below.  (Masking q
    # instead would also be correct; at least one operand MUST be masked.)
    if b_s != B:
        row_ids = lax.broadcasted_iota(jnp.int32, k.shape, 0)
        k = jnp.where(row_ids < b_s, k, 0.0)

    # att = k^T @ q   (the 1/sqrt(k_dim) scale is pre-folded into wk/bk).
    # Contract over the batch axis directly so no explicit k transpose (XLU
    # relayout) is materialized.
    att = lax.dot_general(k.astype(compute_dtype), q.astype(compute_dtype),
                          dimension_numbers=(((0,), (0,)), ((), ())),
                          preferred_element_type=jnp.float32)

    # Exclude zero-padded feature columns from the softmax normalization.
    if a != A:
        col_ids = lax.broadcasted_iota(jnp.int32, att.shape, 1)
        att = jnp.where(col_ids < a, att, -1e30)

    att = att - jnp.max(att, axis=-1, keepdims=True)
    att = jnp.exp(att)
    # Approx reciprocal goes to the EUP slot (essentially free); rows sum to
    # 1 +- ~1e-3 relative.
    att = att * pl.reciprocal(jnp.sum(att, axis=-1, keepdims=True), approx=True)

    # dropout: identity (eval mode).

    # out = v @ att, then fc_o.  f32 accumulation throughout.
    out = jnp.dot(v.astype(compute_dtype), att.astype(compute_dtype),
                  preferred_element_type=jnp.float32)
    out = jnp.dot(out.astype(compute_dtype), wo_ref[...],
                  preferred_element_type=jnp.float32) + bo_ref[...]
    o_ref[...] = out.astype(o_ref.dtype)


def prepare_params(wq, bq, wk, bk, wv, bv, wo, bo, *, k_dim,
                   compute_dtype=jnp.bfloat16):
    """One-time parameter preparation (hoisted out of the per-call path).

    - zero-pads every weight to lane-dense (A, A), A = roundup(a, 128),
    - fuses Q/K/V projections into one (A, 3A) weight / (1, 3A) bias,
    - folds the 1/sqrt(k_dim) attention scale into the K slice,
    - casts weights to `compute_dtype` (bf16 by default -> native MXU input,
      half the weight DMA).  Biases stay f32 (added post f32-accumulation).

    Weights are (in, out) so the kernel computes x @ W + b (== PyTorch
    y = x @ W.T + b); biases are (1, out).
    """
    a = wq.shape[0]
    assert (wq.shape[1] == wk.shape[1] == wv.shape[1] == a
            and wo.shape[0] == wo.shape[1] == a), \
        "reference forward only type-checks when h*q == h*k == h*v == a"
    A = _round_up(a, 128)
    scale = 1.0 / float(jnp.sqrt(jnp.float32(k_dim)))

    def pad_w(w, s=1.0):                   # (in, out) -> (A, A), f32
        return jnp.zeros((A, A), jnp.float32).at[:w.shape[0], :w.shape[1]].set(
            w.astype(jnp.float32) * s)

    def pad_b(b, s=1.0):                   # (1, out) -> (1, A), f32
        return jnp.zeros((1, A), jnp.float32).at[:, :b.shape[1]].set(
            b.astype(jnp.float32) * s)

    w_qkv = jnp.concatenate([pad_w(wq), pad_w(wk, scale), pad_w(wv)],
                            axis=1).astype(compute_dtype)
    b_qkv = jnp.concatenate([pad_b(bq), pad_b(bk, scale), pad_b(bv)], axis=1)
    return {
        "w_qkv": w_qkv,                          # (A, 3A) compute_dtype
        "b_qkv": b_qkv,                          # (1, 3A) f32
        "wo": pad_w(wo).astype(compute_dtype),   # (A, A)  compute_dtype
        "bo": pad_b(bo),                         # (1, A)  f32
        "a": a,
        "compute_dtype": compute_dtype,
    }


def _vmem_limit_bytes(resident_bytes):
    """Generation-aware VMEM budget: sized from the actual buffers, clamped
    to 90% of the physical VMEM of the current chip."""
    try:
        cap = int(pltpu.get_tpu_info().vmem_capacity_bytes)
    except Exception:
        cap = 64 * 1024 * 1024            # conservative (v7x-sized) fallback
    need = 2 * int(resident_bytes) + (8 << 20)   # double-buffered IO + slack
    return int(max(min(need, int(0.9 * cap)), 16 << 20))


@functools.partial(jax.jit, static_argnames=("a", "compute_dtype"))
def _self_attention_padded(x, w_qkv, b_qkv, wo, bo, *, a, compute_dtype):
    b_s = x.shape[0]
    A = wo.shape[0]
    B = _round_up(b_s, 8)

    # Lane/sublane-dense, pre-cast input (zero padding + in-kernel masks keep
    # the valid region identical to the unpadded math).
    x_p = jnp.zeros((B, A), compute_dtype).at[:b_s, :a].set(
        x.astype(compute_dtype))

    itemsize = jnp.dtype(compute_dtype).itemsize
    io_bytes = (x_p.size * itemsize + w_qkv.size * itemsize
                + wo.size * itemsize + b_qkv.size * 4 + bo.size * 4
                + B * A * 4)                                 # f32 output
    interm_bytes = 4 * (3 * B * A + 2 * A * A + 2 * B * A)   # qkv, logits, out
    flops = (2 * B * A * (3 * A)     # fused QKV projection
             + 2 * A * A * B         # k^T @ q
             + 2 * B * A * A         # v @ att
             + 2 * B * A * A)        # fc_o

    vmem = pl.BlockSpec(memory_space=pltpu.MemorySpace.VMEM)
    out_p = pl.pallas_call(
        functools.partial(_self_attention_kernel, a=a, b_s=b_s,
                          compute_dtype=compute_dtype),
        out_shape=jax.ShapeDtypeStruct((B, A), jnp.float32),
        in_specs=[vmem] * 5,
        out_specs=vmem,
        cost_estimate=pl.CostEstimate(flops=flops, transcendentals=A * A,
                                      bytes_accessed=io_bytes),
        compiler_params=pltpu.CompilerParams(
            vmem_limit_bytes=_vmem_limit_bytes(io_bytes + interm_bytes)),
    )(x_p, w_qkv, b_qkv, wo, bo)
    return out_p[:b_s, :a]


def self_attention(x, params):
    """Forward pass of Self_Attention (eval mode) for x of shape (b_s, a),
    using parameters prepared once by prepare_params()."""
    out = _self_attention_padded(x, params["w_qkv"], params["b_qkv"],
                                 params["wo"], params["bo"],
                                 a=params["a"],
                                 compute_dtype=params["compute_dtype"])
    return out.astype(x.dtype)


def _reference(x, wq, bq, wk, bk, wv, bv, wo, bo, k_dim):
    """Pure-JAX re-statement of the PyTorch forward (eval mode)."""
    q = x @ wq + bq
    k = x @ wk + bk
    v = x @ wv + bv
    att = (k.T @ q) / jnp.sqrt(jnp.float32(k_dim))
    att = jax.nn.softmax(att, axis=-1)
    out = v @ att
    return out @ wo + bo


def _init_linear(key, fan_in, fan_out):
    """Deterministic synthetic init; W as (in, out), b as (1, out)."""
    kw, kb = jax.random.split(key)
    scale = 1.0 / jnp.sqrt(jnp.float32(fan_in))
    w = jax.random.uniform(kw, (fan_in, fan_out), jnp.float32, -scale, scale)
    b = jax.random.uniform(kb, (1, fan_out), jnp.float32, -scale, scale)
    return w, b


if __name__ == "__main__":
    # Shapes consistent with the reference forward: h*q == h*k == h*v == a.
    a, h = 32, 4
    k_dim = v_dim = q_dim = a // h          # 8
    b_s = 8

    root = jax.random.PRNGKey(0)
    kq, kk, kv, ko, kx = jax.random.split(root, 5)

    wq, bq = _init_linear(kq, a, h * q_dim)   # fc_q: a -> h*q
    wk, bk = _init_linear(kk, a, h * k_dim)   # fc_k: a -> h*k
    wv, bv = _init_linear(kv, a, h * v_dim)   # fc_v: a -> h*v
    wo, bo = _init_linear(ko, h * v_dim, a)   # fc_o: h*v -> a

    x = jax.random.normal(kx, (b_s, a), jnp.float32)
    ref = _reference(x, wq, bq, wk, bk, wv, bv, wo, bo, k_dim)

    # Default path: bf16 MXU operands, f32 accumulation + f32 softmax.
    params_bf16 = prepare_params(wq, bq, wk, bk, wv, bv, wo, bo,
                                 k_dim=k_dim, compute_dtype=jnp.bfloat16)
    out_bf16 = jax.block_until_ready(self_attention(x, params_bf16))

    # f32 path for a tight numerical check of the kernel structure.
    params_f32 = prepare_params(wq, bq, wk, bk, wv, bv, wo, bo,
                                k_dim=k_dim, compute_dtype=jnp.float32)
    out_f32 = jax.block_until_ready(self_attention(x, params_f32))

    assert out_bf16.shape == (b_s, a) and out_f32.shape == (b_s, a)
    assert bool(jnp.all(jnp.isfinite(out_bf16)))
    assert bool(jnp.all(jnp.isfinite(out_f32)))
    # f32 path: only the approx-reciprocal softmax denominator deviates.
    assert bool(jnp.allclose(out_f32, ref, rtol=2e-3, atol=2e-3))
    # bf16 path: bf16 operand rounding on top of the approx reciprocal.
    assert bool(jnp.allclose(out_bf16, ref, rtol=3e-2, atol=3e-2))
    print("KERNEL_OK")
</pallas_src>

<mosaic_0001>
module attributes {stable_mosaic.version = 11 : i64} {
  func.func @_self_attention_kernel(%arg0: memref<8x128xbf16, #tpu.memory_space<vmem>>, %arg1: memref<128x384xbf16, #tpu.memory_space<vmem>>, %arg2: memref<1x384xf32, #tpu.memory_space<vmem>>, %arg3: memref<128x128xbf16, #tpu.memory_space<vmem>>, %arg4: memref<1x128xf32, #tpu.memory_space<vmem>>, %arg5: memref<8x128xf32, #tpu.memory_space<vmem>>) attributes {dimension_semantics = [], scalar_prefetch = 0 : i64, scratch_operands = 0 : i64, tpu.core_type = #tpu.core_type<tc>} {
    %c0 = arith.constant 0 : index
    %c0_0 = arith.constant 0 : index
    %0 = vector.load %arg0[%c0, %c0_0] : memref<8x128xbf16, #tpu.memory_space<vmem>>, vector<8x128xbf16>
    %c0_1 = arith.constant 0 : index
    %c0_2 = arith.constant 0 : index
    %1 = vector.load %arg1[%c0_1, %c0_2] : memref<128x384xbf16, #tpu.memory_space<vmem>>, vector<128x384xbf16>
    %cst = arith.constant dense<0.000000e+00> : vector<8x384xf32>
    %2 = tpu.matmul %0, %1, %cst {dimension_numbers = #tpu.dot_dimension_numbers<[1], [0], [0], [1], [0, 0, 1, 1], [], []>} : vector<8x128xbf16>, vector<128x384xbf16>, vector<8x384xf32> -> vector<8x384xf32>
    %c0_3 = arith.constant 0 : index
    %c0_4 = arith.constant 0 : index
    %3 = vector.load %arg2[%c0_3, %c0_4] : memref<1x384xf32, #tpu.memory_space<vmem>>, vector<1x384xf32>
    %4 = vector.broadcast %3 : vector<1x384xf32> to vector<8x384xf32>
    %5 = arith.addf %2, %4 : vector<8x384xf32>
    %6 = vector.extract_strided_slice %5 {offsets = [0, 0], sizes = [8, 128], strides = [1, 1]} : vector<8x384xf32> to vector<8x128xf32>
    %7 = vector.extract_strided_slice %5 {offsets = [0, 128], sizes = [8, 128], strides = [1, 1]} : vector<8x384xf32> to vector<8x128xf32>
    %8 = vector.extract_strided_slice %5 {offsets = [0, 256], sizes = [8, 128], strides = [1, 1]} : vector<8x384xf32> to vector<8x128xf32>
    %9 = arith.truncf %7 : vector<8x128xf32> to vector<8x128xbf16>
    %10 = arith.truncf %6 : vector<8x128xf32> to vector<8x128xbf16>
    %cst_5 = arith.constant dense<0.000000e+00> : vector<128x128xf32>
    %11 = tpu.matmul %9, %10, %cst_5 {dimension_numbers = #tpu.dot_dimension_numbers<[0], [0], [1], [1], [0, 1, 1, 1], [], []>} : vector<8x128xbf16>, vector<8x128xbf16>, vector<128x128xf32> -> vector<128x128xf32>
    %12 = tpu.iota {dimensions = array<i32: 1>} : vector<128x128xi32>
    %c32_i32 = arith.constant 32 : i32
    %13 = vector.broadcast %c32_i32 : i32 to vector<128x128xi32>
    %14 = arith.cmpi slt, %12, %13 : vector<128x128xi32>
    %cst_6 = arith.constant -1.000000e+30 : f32
    %15 = vector.broadcast %cst_6 : f32 to vector<128x128xf32>
    %16 = arith.select %14, %11, %15 : vector<128x128xi1>, vector<128x128xf32>
    %cst_7 = arith.constant dense<0xFF800000> : vector<128xf32>
    %17 = vector.multi_reduction <maximumf>, %16, %cst_7 [1] : vector<128x128xf32> to vector<128xf32>
    %18 = vector.shape_cast %17 : vector<128xf32> to vector<128x1xf32>
    %19 = vector.broadcast %18 : vector<128x1xf32> to vector<128x128xf32>
    %20 = arith.subf %16, %19 : vector<128x128xf32>
    %21 = math.exp %20 : vector<128x128xf32>
    %cst_8 = arith.constant dense<0.000000e+00> : vector<128xf32>
    %22 = vector.multi_reduction <add>, %21, %cst_8 [1] : vector<128x128xf32> to vector<128xf32>
    %23 = vector.shape_cast %22 : vector<128xf32> to vector<128x1xf32>
    %24 = tpu.reciprocal %23 {approx = true} : vector<128x1xf32> -> vector<128x1xf32>
    %25 = vector.broadcast %24 : vector<128x1xf32> to vector<128x128xf32>
    %26 = arith.mulf %21, %25 : vector<128x128xf32>
    %27 = arith.truncf %8 : vector<8x128xf32> to vector<8x128xbf16>
    %28 = arith.truncf %26 : vector<128x128xf32> to vector<128x128xbf16>
    %cst_9 = arith.constant dense<0.000000e+00> : vector<8x128xf32>
    %29 = tpu.matmul %27, %28, %cst_9 {dimension_numbers = #tpu.dot_dimension_numbers<[1], [0], [0], [1], [0, 0, 1, 1], [], []>} : vector<8x128xbf16>, vector<128x128xbf16>, vector<8x128xf32> -> vector<8x128xf32>
    %30 = arith.truncf %29 : vector<8x128xf32> to vector<8x128xbf16>
    %c0_10 = arith.constant 0 : index
    %c0_11 = arith.constant 0 : index
    %31 = vector.load %arg3[%c0_10, %c0_11] : memref<128x128xbf16, #tpu.memory_space<vmem>>, vector<128x128xbf16>
    %cst_12 = arith.constant dense<0.000000e+00> : vector<8x128xf32>
    %32 = tpu.matmul %30, %31, %cst_12 {dimension_numbers = #tpu.dot_dimension_numbers<[1], [0], [0], [1], [0, 0, 1, 1], [], []>} : vector<8x128xbf16>, vector<128x128xbf16>, vector<8x128xf32> -> vector<8x128xf32>
    %c0_13 = arith.constant 0 : index
    %c0_14 = arith.constant 0 : index
    %33 = vector.load %arg4[%c0_13, %c0_14] : memref<1x128xf32, #tpu.memory_space<vmem>>, vector<1x128xf32>
    %34 = vector.broadcast %33 : vector<1x128xf32> to vector<8x128xf32>
    %35 = arith.addf %32, %34 : vector<8x128xf32>
    %c0_15 = arith.constant 0 : index
    %c0_16 = arith.constant 0 : index
    %36 = vector.load %arg5[%c0_15, %c0_16] : memref<8x128xf32, #tpu.memory_space<vmem>>, vector<8x128xf32>
    tpu.vector_store %arg5[%c0_15, %c0_16], %35 {strides = array<i32>} : memref<8x128xf32, #tpu.memory_space<vmem>>, vector<8x128xf32>,
    return
  }
}

</mosaic_0001>

<bundles_post_ra>
// kernel: _self_attention_padded.1
= control target key start
LH: loop header
LB: loop body
LE: loop exit
PB: predicated region body
PF: predicated region fallthrough
CT: control target
= control target key end

     0   :  { %10 = vsyncpa [#allocation3], 0  ;;  %s1156_s0 = inlined_call_operand.vmem [shape: bf16[8,128], index: 0, kind: input, shape index: {}]   ;;  %s1157_s1 = inlined_call_operand.hbm [shape: bf16[128,384], index: 1, kind: input, shape index: {}]   ;;  %s1158_s2 = inlined_call_operand.vmem [shape: f32[1,384], index: 2, kind: input, shape index: {}]   ;;  %s1159_s3 = inlined_call_operand.hbm [shape: bf16[128,128], index: 3, kind: input, shape index: {}]   ;;  %s1160_s4 = inlined_call_operand.vmem [shape: f32[1,128], index: 4, kind: input, shape index: {}]   ;;  %s1161_s5 = inlined_call_operand.hbm [shape: f32[8,128], index: 5, kind: output, shape index: {}]  }
   0x1   :  { %11 = vsyncpa [#allocation6], 0 }
   0x2   :  { %12 = vsyncpa [#allocation4], 0  ;;  %s19_s20 = sshll.u32 %s1157_s1, 4  ;;  %s964_s21 = smov [#allocation2]   ;;  %s20_s20 = int_to_ptr.hbm [resolvable:$true] %s19_s20 }
   0x3   :  { %s21_s22 = sshll.u32 %s964_s21, 4  ;;  %s34_s25 = sshll.u32 %s1159_s3, 4  ;;  %s22_s22 = int_to_ptr.vmem [resolvable:$true] %s21_s22  ;;  %s35_s25 = int_to_ptr.hbm [resolvable:$true] %s34_s25 }
   0x4   :  { %s965_s26 = smov 192   ;;  %s966_s27 = smov 12  }
   0x5   :  { %27 = dma.hbm_to_vmem [thread:$0]  %s20_s20, 3072, %s22_s22, [#allocation3], %s965_s26, %s965_s26, %s966_s27  }
   0x6   :  { %s967_s28 = smov [#allocation5]   ;;  %s968_s30 = smov 64  }
   0x7   :  { %s36_s29 = sshll.u32 %s967_s28, 4  ;;  %s969_s6 = smov 4   ;;  %s37_s29 = int_to_ptr.vmem [resolvable:$true] %s36_s29 }
   0x8   :  { %42 = dma.hbm_to_vmem [thread:$0]  %s35_s25, 1024, %s37_s29, [#allocation6], %s968_s30, %s968_s30, %s969_s6  }
   0x9   :  { %958 = dma.done.wait [#allocation3], 3072  }
   0xa   :  { %959 = vsyncadd [#allocation3], 4294964224 }
   0xb   :  { %960 = dma.done.wait [#allocation6], 1024  }
   0xc   :  { %961 = vsyncadd [#allocation6], 4294966272  ;;  %v801_v0 = vld [vmem:[#allocation2 + $0xac] sm:$0xf]  ;;  %v732_v1 = vld [vmem:[#allocation2 + $0xb4] sm:$0xf0] }
   0xd   :  { %v798_v2 = vld [vmem:[#allocation2 + $0x94] sm:$0xf]  ;;  %v735_v3 = vor.u32 %v801_v0, %v732_v1  ;;  %v720_v4 = vld [vmem:[#allocation2 + $0x9c] sm:$0xf0]  ;;  %v795_v6 = vld [vmem:[#allocation2 + $0x7c] sm:$0xf] }
   0xe   :  { %v723_v5 = vor.u32 %v798_v2, %v720_v4  ;;  %v708_v7 = vld [vmem:[#allocation2 + $0x84] sm:$0xf0]  ;;  %v792_v9 = vld [vmem:[#allocation2 + $0x64] sm:$0xf]  ;;  %v696_v10 = vld [vmem:[#allocation2 + $0x6c] sm:$0xf0] }
   0xf   :  { %236 = vmatpush.bf16.msra.mxu1 %v735_v3  ;;  %v711_v8 = vor.u32 %v795_v6, %v708_v7  ;;  %v699_v11 = vor.u32 %v792_v9, %v696_v10  ;;  %v789_v12 = vld [vmem:[#allocation2 + $0x4c] sm:$0xf]  ;;  %v684_v13 = vld [vmem:[#allocation2 + $0x54] sm:$0xf0]  ;;  %v786_v15 = vld [vmem:[#allocation2 + $0x34] sm:$0xf] }
  0x10   :  { %v687_v14 = vor.u32 %v789_v12, %v684_v13  ;;  %v672_v16 = vld [vmem:[#allocation2 + $0x3c] sm:$0xf0]  ;;  %v783_v18 = vld [vmem:[#allocation2 + $0x1c] sm:$0xf]  ;;  %v660_v19 = vld [vmem:[#allocation2 + $0x24] sm:$0xf0] }
  0x11   :  { %v675_v17 = vor.u32 %v786_v15, %v672_v16  ;;  %v663_v20 = vor.u32 %v783_v18, %v660_v19  ;;  %v780_v21 = vld [vmem:[#allocation2 + $0x4] sm:$0xf]  ;;  %v648_v22 = vld [vmem:[#allocation2 + $0xc] sm:$0xf0]  ;;  %v1010_v24 = vld [vmem:[%s1156_s0] sm:$0xf] }
  0x12   :  { %v651_v23 = vor.u32 %v780_v21, %v648_v22  ;;  %v730_v25 = vld [vmem:[#allocation2 + $0xa8] sm:$0xf]  ;;  %v802_v26 = vld [vmem:[#allocation2 + $0xb0] sm:$0xf0]  ;;  %v718_v27 = vld [vmem:[#allocation2 + $0x90] sm:$0xf] }
  0x13   :  { %237 = vmatpush.bf16.msra.mxu1 %v723_v5  ;;  %v731_v28 = vor.u32 %v802_v26, %v730_v25  ;;  %v799_v29 = vld [vmem:[#allocation2 + $0x98] sm:$0xf0]  ;;  %v706_v31 = vld [vmem:[#allocation2 + $0x78] sm:$0xf]  ;;  %v796_v32 = vld [vmem:[#allocation2 + $0x80] sm:$0xf0] }
  0x14   :  { %v719_v30 = vor.u32 %v799_v29, %v718_v27  ;;  %v738_v33 = vld [vmem:[#allocation2 + $0xb0] sm:$0xf]  ;;  %v803_v34 = vld [vmem:[#allocation2 + $0xb8] sm:$0xf0]  ;;  %v726_v36 = vld [vmem:[#allocation2 + $0x98] sm:$0xf]  ;;  %v707_v38 = vor.u32 %v796_v32, %v706_v31 }
  0x15   :  { %223 = vmatpush.bf16.msra.mxu0 %v731_v28  ;;  %v739_v35 = vor.u32 %v803_v34, %v738_v33  ;;  %v800_v37 = vld [vmem:[#allocation2 + $0xa0] sm:$0xf0]  ;;  %v694_v39 = vld [vmem:[#allocation2 + $0x60] sm:$0xf]  ;;  %v793_v40 = vld [vmem:[#allocation2 + $0x68] sm:$0xf0] }
  0x16   :  { %v727_v41 = vor.u32 %v800_v37, %v726_v36  ;;  %v714_v42 = vld [vmem:[#allocation2 + $0x80] sm:$0xf]  ;;  %v797_v43 = vld [vmem:[#allocation2 + $0x88] sm:$0xf0]  ;;  %v695_v44 = vor.u32 %v793_v40, %v694_v39  ;;  %v682_v45 = vld [vmem:[#allocation2 + $0x48] sm:$0xf]  ;;  %v358_v39 = vlaneseq }
  0x17   :  { %238 = vmatpush.bf16.msra.mxu1 %v711_v8  ;;  %249 = vmatpush.bf16.msra.mxu2 %v739_v35  ;;  %v790_v46 = vld [vmem:[#allocation2 + $0x50] sm:$0xf0]  ;;  %v715_v47 = vor.u32 %v797_v43, %v714_v42  ;;  %v702_v48 = vld [vmem:[#allocation2 + $0x68] sm:$0xf]  ;;  %v670_v51 = vld [vmem:[#allocation2 + $0x30] sm:$0xf] }
  0x18   :  { %v794_v49 = vld [vmem:[#allocation2 + $0x70] sm:$0xf0]  ;;  %v683_v50 = vor.u32 %v790_v46, %v682_v45  ;;  %v787_v52 = vld [vmem:[#allocation2 + $0x38] sm:$0xf0]  ;;  %v690_v54 = vld [vmem:[#allocation2 + $0x50] sm:$0xf] }
  0x19   :  { %224 = vmatpush.bf16.msra.mxu0 %v719_v30  ;;  %v703_v53 = vor.u32 %v794_v49, %v702_v48  ;;  %v791_v55 = vld [vmem:[#allocation2 + $0x58] sm:$0xf0]  ;;  %v1016_v56 = vld [vmem:[%s1158_s2] sm:$0x7]  ;;  %v671_v57 = vor.u32 %v787_v52, %v670_v51  ;;  %v658_v58 = vld [vmem:[#allocation2 + $0x18] sm:$0xf] }
  0x1a   :  { %v784_v59 = vld [vmem:[#allocation2 + $0x20] sm:$0xf0]  ;;  %v691_v60 = vor.u32 %v791_v55, %v690_v54  ;;  %v90_v61 = vperm.slane %v1016_v56, 1  ;;  %v678_v62 = vld [vmem:[#allocation2 + $0x38] sm:$0xf]  ;;  %v89_v15 = vperm.slane %v1016_v56, 0 }
  0x1b   :  { %239 = vmatpush.bf16.msra.mxu1 %v699_v11  ;;  %250 = vmatpush.bf16.msra.mxu2 %v727_v41  ;;  %v788_v63 = vld [vmem:[#allocation2 + $0x40] sm:$0xf0]  ;;  %v659_v0 = vor.u32 %v784_v59, %v658_v58  ;;  %v646_v2 = vld [vmem:[#allocation2] sm:$0xf]  ;;  %v781_v3 = vld [vmem:[#allocation2 + $0x8] sm:$0xf0] }
  0x1c   :  { %v679_v4 = vor.u32 %v788_v63, %v678_v62  ;;  %v666_v6 = vld [vmem:[#allocation2 + $0x20] sm:$0xf]  ;;  %v785_v7 = vld [vmem:[#allocation2 + $0x28] sm:$0xf0]  ;;  %v647_v9 = vor.u32 %v781_v3, %v646_v2  ;;  %v654_v11 = vld [vmem:[#allocation2 + $0x8] sm:$0xf] }
  0x1d   :  { %225 = vmatpush.bf16.msra.mxu0 %v707_v38  ;;  %v667_v10 = vor.u32 %v785_v7, %v666_v6  ;;  %v782_v12 = vld [vmem:[#allocation2 + $0x10] sm:$0xf0]  ;;  %vm305_vm0 = vcmask 1043456   ;;  %vm280_vm1 = vcmask 64512   ;;  %v359_v40 = vand.u32 127, %v358_v39  ;;  %s970_s9 = smov [#allocation7]  }
  0x1e   :  { %s631_s10 = sshll.u32 %s970_s9, 4  ;;  %s633_s13 = sshll.u32 %s1161_s5, 4  ;;  %s632_s10 = int_to_ptr.vmem [resolvable:$true] %s631_s10  ;;  %s634_s13 = int_to_ptr.hbm [resolvable:$true] %s633_s13 }
  0x1f   :  { %240 = vmatpush.bf16.msra.mxu1 %v687_v14  ;;  %251 = vmatpush.bf16.msra.mxu2 %v715_v47  ;;  %v655_v14 = vor.u32 %v782_v12, %v654_v11  ;;  %vm360_vm2 = vcmp.lt.s32.totalorder %v359_v40, 32 }
  0x21   :  { %226 = vmatpush.bf16.msra.mxu0 %v695_v44 }
  0x23   :  { %241 = vmatpush.bf16.msra.mxu1 %v675_v17  ;;  %252 = vmatpush.bf16.msra.mxu2 %v703_v53 }
  0x25   :  { %227 = vmatpush.bf16.msra.mxu0 %v683_v50 }
  0x27   :  { %242 = vmatpush.bf16.msra.mxu1 %v663_v20  ;;  %253 = vmatpush.bf16.msra.mxu2 %v691_v60 }
  0x29   :  { %228 = vmatpush.bf16.msra.mxu0 %v671_v57 }
  0x2b   :  { %243 = vmatpush.bf16.msra.mxu1 %v651_v23  ;;  %254 = vmatpush.bf16.msra.mxu2 %v679_v4 }
  0x2d   :  { %229 = vmatpush.bf16.msra.mxu0 %v659_v0 }
  0x2e   :  { %244 = vmatmul.bf16.vlgmr.msra.gmra.mxu1 %v1010_v24 }
  0x2f   :  { %255 = vmatpush.bf16.msra.mxu2 %v667_v10 }
  0x31   :  { %230 = vmatpush.bf16.msra.mxu0 %v647_v9 }
  0x33   :  { %256 = vmatpush.bf16.msra.mxu2 %v655_v14 }
  0x34   :  { %231 = vmatmul.bf16.vlgmr.msra.gmra.mxu0 %v1010_v24 }
  0x36   :  { %257 = vmatmul.bf16.vlgmr.msra.gmra.mxu2 %v1010_v24 }
  0xab   :  { %v245_v1 = vpop.f32.mrf.mxu1 }
  0xac   :  { %v246_v5 = vadd.f32 %v245_v1, %v90_v61 }
  0xae   :  { %v262_v8 = vpack.c.bf16 %v246_v5, %v246_v5 }
  0xb0   :  { %264 = vxpose.xlu0.c.b16.start.end [1/1] (short) %v262_v8, 128 }
  0xb1   :  { %v232_v16 = vpop.f32.mrf.mxu0 }
  0xb2   :  { %v233_v17 = vadd.f32 %v232_v16, %v89_v15 }
  0xb3   :  { %v247_v13 = vpop.f32.mrf.mxu1 }
  0xb4   :  { %v263_v18 = vpack.c.bf16 %v233_v17, %v233_v17 }
  0xb6   :  { %v307_v19 = vsel %vm305_vm0, %v263_v18, 0 }
  0xb7   :  { %316 = vmatpush.bf16.msrb.mxu2 %v307_v19  ;;  %812 = vmatpush.bf16.msra.mxu3 %v307_v19 }
  0xb9   :  { %v234_v20 = vpop.f32.mrf.mxu0  ;;  %v1028_v27 = vpop.f32.mrf.mxu2 }
  0xc1   :  { %v260_v28 = vpop.f32.mrf.mxu2 }
 0x15c   :  { %v272_v21 = vpop.trf.xlu0 }
 0x15d   :  { %740 = vmatmul.msk.bf16.vlgmr.msrb.gmra.mxu2 %vm280_vm1, %v272_v21 }
 0x16c   :  { %v273_v22 = vpop.trf.xlu0 }
 0x16d   :  { %741 = vmatmul.msk.bf16.gmra.mxu2 %vm280_vm1, %v273_v22 }
 0x17c   :  { %v274_v23 = vpop.trf.xlu0 }
 0x17d   :  { %742 = vmatmul.msk.bf16.vlgmr.msra.gmra.mxu3 %vm280_vm1, %v274_v23 }
 0x18c   :  { %v275_v24 = vpop.trf.xlu0 }
 0x18d   :  { %743 = vmatmul.msk.bf16.gmra.mxu3 %vm280_vm1, %v275_v24 }
 0x19c   :  { %v276_v25 = vpop.trf.xlu0 }
 0x19d   :  { %744 = vmatmul.msk.bf16.gmra.mxu3 %vm280_vm1, %v276_v25 }
 0x1ac   :  { %v277_v26 = vpop.trf.xlu0 }
 0x1ad   :  { %745 = vmatmul.msk.bf16.gmra.mxu3 %vm280_vm1, %v277_v26 }
 0x1bc   :  { %v278_v29 = vpop.trf.xlu0 }
 0x1bd   :  { %746 = vmatmul.msk.bf16.gmra.mxu3 %vm280_vm1, %v278_v29 }
 0x1cc   :  { %v279_v30 = vpop.trf.xlu0 }
 0x1cd   :  { %747 = vmatmul.msk.bf16.gmra.mxu3 %vm280_vm1, %v279_v30 }
 0x1e0   :  { %v318_v46 = vpop.f32.mrf.mxu2 }
 0x1e1   :  { %v1071_v0 = vsel %vm360_vm2, %v318_v46, -1e+30 }
 0x1e8   :  { %v320_v53 = vpop.f32.mrf.mxu2 }
 0x1e9   :  { %v1074_v1 = vsel %vm360_vm2, %v320_v53, -1e+30 }
 0x1f0   :  { %v323_v57 = vpop.f32.mrf.mxu2 }
 0x1f1   :  { %v1063_v62 = vsel %vm360_vm2, %v323_v57, -1e+30 }
 0x1f8   :  { %v325_v61 = vpop.f32.mrf.mxu2 }
 0x1f9   :  { %v1066_v63 = vsel %vm360_vm2, %v325_v61, -1e+30 }
 0x200   :  { %v328_v31 = vpop.f32.mrf.mxu3 }
 0x201   :  { %v1059_v60 = vsel %vm360_vm2, %v328_v31, -1e+30 }
 0x208   :  { %v330_v32 = vpop.f32.mrf.mxu3 }
 0x209   :  { %v1050_v54 = vsel %vm360_vm2, %v330_v32, -1e+30 }
 0x210   :  { %v333_v33 = vpop.f32.mrf.mxu3 }
 0x211   :  { %v1053_v55 = vsel %vm360_vm2, %v333_v33, -1e+30 }
 0x218   :  { %v335_v34 = vpop.f32.mrf.mxu3 }
 0x219   :  { %v1045_v51 = vsel %vm360_vm2, %v335_v34, -1e+30 }
 0x220   :  { %v338_v35 = vpop.f32.mrf.mxu3 }
 0x221   :  { %v369_v52 = vsel %vm360_vm2, %v338_v35, -1e+30 }
 0x228   :  { %v340_v36 = vpop.f32.mrf.mxu3 }
 0x229   :  { %v370_v48 = vsel %vm360_vm2, %v340_v36, -1e+30 }
 0x230   :  { %v343_v37 = vpop.f32.mrf.mxu3 }
 0x231   :  { %v371_v49 = vsel %vm360_vm2, %v343_v37, -1e+30 }
 0x238   :  { %v345_v38 = vpop.f32.mrf.mxu3 }
 0x239   :  { %v372_v44 = vsel %vm360_vm2, %v345_v38, -1e+30 }
 0x240   :  { %v348_v41 = vpop.f32.mrf.mxu3 }
 0x241   :  { %v1033_v42 = vsel %vm360_vm2, %v348_v41, -1e+30 }
 0x242   :  { %401 = vmax.xlane.f32.xlu1 %v1033_v42 }
 0x248   :  { %v350_v43 = vpop.f32.mrf.mxu3 }
 0x249   :  { %v374_v45 = vsel %vm360_vm2, %v350_v43, -1e+30 }
 0x24a   :  { %399 = vmax.xlane.f32.xlu1 %v372_v44  ;;  %403 = vmax.xlane.f32.xlu2 %v374_v45 }
 0x250   :  { %v353_v47 = vpop.f32.mrf.mxu3 }
 0x251   :  { %v1041_v50 = vsel %vm360_vm2, %v353_v47, -1e+30 }
 0x252   :  { %395 = vmax.xlane.f32.xlu1 %v370_v48  ;;  %397 = vmax.xlane.f32.xlu2 %v371_v49 }
 0x253   :  { %405 = vmax.xlane.f32.xlu0 %v1041_v50 }
 0x258   :  { %v355_v58 = vpop.f32.mrf.mxu3 }
 0x259   :  { %v376_v59 = vsel %vm360_vm2, %v355_v58, -1e+30 }
 0x25a   :  { %391 = vmax.xlane.f32.xlu1 %v1045_v51  ;;  %393 = vmax.xlane.f32.xlu2 %v369_v52 }
 0x262   :  { %387 = vmax.xlane.f32.xlu1 %v1050_v54  ;;  %389 = vmax.xlane.f32.xlu2 %v1053_v55 }
 0x26a   :  { %385 = vmax.xlane.f32.xlu2 %v1059_v60  ;;  %407 = vmax.xlane.f32.xlu1 %v376_v59 }
 0x272   :  { %381 = vmax.xlane.f32.xlu2 %v1063_v62  ;;  %383 = vmax.xlane.f32.xlu1 %v1066_v63 }
 0x27a   :  { %377 = vmax.xlane.f32.xlu2 %v1071_v0  ;;  %379 = vmax.xlane.f32.xlu1 %v1074_v1 }
 0x2b5   :  { %v402_v2 = vpop.xlane.xlu1 %401 }
 0x2b6   :  { %v421_v23 = vsub.f32 %v1033_v42, %v402_v2 }
 0x2b8   :  { %v449_v25 = vmul.f32 1.442695, %v421_v23 }
 0x2bd   :  { %v400_v3 = vpop.xlane.xlu1 %399  ;;  %v404_v4 = vpop.xlane.xlu2 %403 }
 0x2be   :  { %v420_v9 = vsub.f32 %v372_v44, %v400_v3  ;;  %v422_v16 = vsub.f32 %v374_v45, %v404_v4 }
 0x2c0   :  { %v447_v12 = vmul.f32 1.442695, %v420_v9  ;;  %v451_v19 = vmul.f32 1.442695, %v422_v16 }
 0x2c5   :  { %v396_v5 = vpop.xlane.xlu1 %395  ;;  %v398_v6 = vpop.xlane.xlu2 %397 }
 0x2c6   :  { %v418_v7 = vsub.f32 %v370_v48, %v396_v5  ;;  %v419_v17 = vsub.f32 %v371_v49, %v398_v6  ;;  %v406_v28 = vpop.xlane.xlu0 %405 }
 0x2c7   :  { %v423_v32 = vsub.f32 %v1041_v50, %v406_v28 }
 0x2c8   :  { %v443_v8 = vmul.f32 1.442695, %v418_v7  ;;  %v445_v20 = vmul.f32 1.442695, %v419_v17 }
 0x2c9   :  { %v453_v35 = vmul.f32 1.442695, %v423_v32 }
 0x2ca   :  { %822 = vpow2.f32 %v443_v8 }
 0x2cb   :  { %824 = vpow2.f32 %v447_v12 }
 0x2cd   :  { %v392_v10 = vpop.xlane.xlu1 %391  ;;  %v394_v11 = vpop.xlane.xlu2 %393 }
 0x2ce   :  { %v417_v13 = vsub.f32 %v369_v52, %v394_v11  ;;  %v416_v34 = vsub.f32 %v1045_v51, %v392_v10 }
 0x2d0   :  { %v1078_v14 = vpop.eup %822  ;;  %v441_v15 = vmul.f32 1.442695, %v417_v13  ;;  %v439_v36 = vmul.f32 1.442695, %v416_v34 }
 0x2d1   :  { %475 = vadd.xlane.f32.xlu1 %v1078_v14  ;;  %v1081_v21 = vpop.eup %824 }
 0x2d2   :  { %826 = vpow2.f32 %v441_v15 }
 0x2d3   :  { %828 = vpow2.f32 %v451_v19 }
 0x2d4   :  { %830 = vpow2.f32 %v445_v20 }
 0x2d5   :  { %v388_v18 = vpop.xlane.xlu1 %387  ;;  %832 = vpow2.f32 %v449_v25  ;;  %v390_v33 = vpop.xlane.xlu2 %389 }
 0x2d6   :  { %v414_v39 = vsub.f32 %v1050_v54, %v388_v18  ;;  %v415_v40 = vsub.f32 %v1053_v55, %v390_v33 }
 0x2d8   :  { %v1083_v22 = vpop.eup %826  ;;  %v435_v42 = vmul.f32 1.442695, %v414_v39  ;;  %v437_v44 = vmul.f32 1.442695, %v415_v40 }
 0x2d9   :  { %479 = vadd.xlane.f32.xlu1 %v1081_v21  ;;  %473 = vadd.xlane.f32.xlu2 %v1083_v22  ;;  %v1088_v29 = vpop.eup %828 }
 0x2da   :  { %v1090_v31 = vpop.eup %830 }
 0x2db   :  { %v1096_v37 = vpop.eup %832 }
 0x2dd   :  { %v408_v24 = vpop.xlane.xlu1 %407  ;;  %v386_v41 = vpop.xlane.xlu2 %385 }
 0x2de   :  { %v424_v26 = vsub.f32 %v376_v59, %v408_v24  ;;  %v413_v47 = vsub.f32 %v1059_v60, %v386_v41 }
 0x2e0   :  { %v455_v30 = vmul.f32 1.442695, %v424_v26  ;;  %v433_v49 = vmul.f32 1.442695, %v413_v47 }
 0x2e1   :  { %483 = vadd.xlane.f32.xlu1 %v1088_v29  ;;  %477 = vadd.xlane.f32.xlu2 %v1090_v31 }
 0x2e2   :  { %834 = vpow2.f32 %v455_v30 }
 0x2e3   :  { %836 = vpow2.f32 %v453_v35  ;;  %v811_v35 = vld [vmem:[#allocation5 + $0x38] sm:$0xff] }
 0x2e4   :  { %838 = vpow2.f32 %v439_v36  ;;  %612 = vmatpush.bf16.msrb.mxu1 %v811_v35 }
 0x2e5   :  { %v384_v43 = vpop.xlane.xlu1 %383  ;;  %840 = vpow2.f32 %v435_v42  ;;  %v382_v50 = vpop.xlane.xlu2 %381 }
 0x2e6   :  { %842 = vpow2.f32 %v437_v44  ;;  %v412_v48 = vsub.f32 %v1066_v63, %v384_v43  ;;  %v411_v55 = vsub.f32 %v1063_v62, %v382_v50  ;;  %v809_v44 = vld [vmem:[#allocation5 + $0x28] sm:$0xff] }
 0x2e7   :  { %844 = vpow2.f32 %v433_v49 }
 0x2e8   :  { %v1098_v38 = vpop.eup %834  ;;  %v431_v51 = vmul.f32 1.442695, %v412_v48  ;;  %v429_v58 = vmul.f32 1.442695, %v411_v55 }
 0x2e9   :  { %481 = vadd.xlane.f32.xlu2 %v1096_v37  ;;  %487 = vadd.xlane.f32.xlu1 %v1098_v38  ;;  %v837_v45 = vpop.eup %836 }
 0x2ea   :  { %v1104_v46 = vpop.eup %838  ;;  %846 = vpow2.f32 %v431_v51 }
 0x2eb   :  { %v1109_v52 = vpop.eup %840  ;;  %848 = vpow2.f32 %v429_v58 }
 0x2ec   :  { %v1111_v54 = vpop.eup %842 }
 0x2ed   :  { %v380_v53 = vpop.xlane.xlu1 %379  ;;  %v1117_v60 = vpop.eup %844 }
 0x2ee   :  { %v410_v57 = vsub.f32 %v1074_v1, %v380_v53  ;;  %v378_v61 = vpop.xlane.xlu2 %377 }
 0x2ef   :  { %v409_v62 = vsub.f32 %v1071_v0, %v378_v61 }
 0x2f0   :  { %v427_v59 = vmul.f32 1.442695, %v410_v57  ;;  %v1119_v63 = vpop.eup %846 }
 0x2f1   :  { %485 = vadd.xlane.f32.xlu2 %v837_v45  ;;  %471 = vadd.xlane.f32.xlu1 %v1104_v46  ;;  %v425_v2 = vmul.f32 1.442695, %v409_v62  ;;  %v1124_v3 = vpop.eup %848 }
 0x2f2   :  { %850 = vpow2.f32 %v427_v59 }
 0x2f3   :  { %852 = vpow2.f32 %v425_v2  ;;  %v806_v2 = vld [vmem:[#allocation5 + $0x10] sm:$0xff] }
 0x2f8   :  { %v1126_v4 = vpop.eup %850 }
 0x2f9   :  { %469 = vadd.xlane.f32.xlu2 %v1111_v54  ;;  %467 = vadd.xlane.f32.xlu1 %v1109_v52  ;;  %v1130_v1 = vpop.eup %852 }
 0x301   :  { %465 = vadd.xlane.f32.xlu2 %v1117_v60  ;;  %463 = vadd.xlane.f32.xlu1 %v1119_v63 }
 0x309   :  { %461 = vadd.xlane.f32.xlu2 %v1124_v3  ;;  %459 = vadd.xlane.f32.xlu1 %v1126_v4 }
 0x311   :  { %457 = vadd.xlane.f32.xlu2 %v1130_v1 }
 0x344   :  { %v476_v5 = vpop.xlane.xlu1 %475 }
 0x34c   :  { %v480_v6 = vpop.xlane.xlu1 %479  ;;  %v474_v7 = vpop.xlane.xlu2 %473 }
 0x354   :  { %v484_v8 = vpop.xlane.xlu1 %483  ;;  %v478_v0 = vpop.xlane.xlu2 %477 }
 0x35c   :  { %v482_v9 = vpop.xlane.xlu2 %481  ;;  %v488_v10 = vpop.xlane.xlu1 %487 }
 0x35d   :  { %854 = vrcp.f32 %v488_v10  ;;  %v804_v10 = vld [vmem:[#allocation5] sm:$0xff] }
 0x35e   :  { %856 = vrcp.f32 %v482_v9 }
 0x363   :  { %v855_v13 = vpop.eup %854 }
 0x364   :  { %v486_v11 = vpop.xlane.xlu2 %485  ;;  %v472_v12 = vpop.xlane.xlu1 %471  ;;  %v520_v20 = vmul.f32 %v855_v13, %v1098_v38  ;;  %v821_v13 = vld [vmem:[%s1160_s4] ss:$0 sm:$0xff] }
 0x365   :  { %858 = vrcp.f32 %v486_v11  ;;  %v857_v15 = vpop.eup %856 }
 0x366   :  { %860 = vrcp.f32 %v484_v8  ;;  %v517_v25 = vmul.f32 %v857_v15, %v1096_v37  ;;  %v810_v37 = vld [vmem:[#allocation5 + $0x30] sm:$0xff] }
 0x367   :  { %862 = vrcp.f32 %v478_v0  ;;  %613 = vmatpush.bf16.msrb.mxu1 %v810_v37 }
 0x368   :  { %864 = vrcp.f32 %v480_v6  ;;  %v805_v6 = vld [vmem:[#allocation5 + $0x8] sm:$0xff] }
 0x369   :  { %866 = vrcp.f32 %v474_v7 }
 0x36a   :  { %868 = vrcp.f32 %v476_v5 }
 0x36b   :  { %v859_v16 = vpop.eup %858  ;;  %614 = vmatpush.bf16.msrb.mxu1 %v809_v44 }
 0x36c   :  { %v470_v17 = vpop.xlane.xlu2 %469  ;;  %v468_v18 = vpop.xlane.xlu1 %467  ;;  %v519_v19 = vmul.f32 %v859_v16, %v837_v45 }
 0x36d   :  { %v861_v23 = vpop.eup %860  ;;  %870 = vrcp.f32 %v470_v17 }
 0x36e   :  { %v529_v24 = vpack.c.bf16 %v520_v20, %v519_v19  ;;  %v863_v26 = vpop.eup %862  ;;  %v518_v28 = vmul.f32 %v861_v23, %v1088_v29  ;;  %872 = vrcp.f32 %v472_v12 }
 0x36f   :  { %v865_v30 = vpop.eup %864  ;;  %v515_v33 = vmul.f32 %v863_v26, %v1090_v31 }
 0x370   :  { %530 = vmatpush.bf16.msrb.mxu0 %v529_v24  ;;  %v528_v32 = vpack.c.bf16 %v518_v28, %v517_v25  ;;  %v867_v34 = vpop.eup %866  ;;  %v516_v38 = vmul.f32 %v865_v30, %v1081_v21 }
 0x371   :  { %v869_v39 = vpop.eup %868  ;;  %v513_v29 = vmul.f32 %v867_v34, %v1083_v22  ;;  %v808_v22 = vld [vmem:[#allocation5 + $0x20] sm:$0xff] }
 0x372   :  { %v527_v41 = vpack.c.bf16 %v516_v38, %v515_v33  ;;  %v514_v31 = vmul.f32 %v869_v39, %v1078_v14  ;;  %615 = vmatpush.bf16.msrb.mxu1 %v808_v22 }
 0x373   :  { %v871_v42 = vpop.eup %870 }
 0x374   :  { %v466_v36 = vpop.xlane.xlu2 %465  ;;  %531 = vmatpush.bf16.msrb.mxu0 %v528_v32  ;;  %v464_v40 = vpop.xlane.xlu1 %463  ;;  %v526_v45 = vpack.c.bf16 %v514_v31, %v513_v29  ;;  %v511_v47 = vmul.f32 %v871_v42, %v1111_v54  ;;  %v807_v54 = vld [vmem:[#allocation5 + $0x18] sm:$0xff] }
 0x375   :  { %874 = vrcp.f32 %v466_v36  ;;  %v873_v43 = vpop.eup %872 }
 0x376   :  { %876 = vrcp.f32 %v468_v18  ;;  %v512_v49 = vmul.f32 %v873_v43, %v1104_v46  ;;  %616 = vmatpush.bf16.msrb.mxu1 %v807_v54 }
 0x377   :  { %878 = vrcp.f32 %v464_v40 }
 0x378   :  { %532 = vmatpush.bf16.msrb.mxu0 %v527_v41  ;;  %v525_v51 = vpack.c.bf16 %v512_v49, %v511_v47 }
 0x37a   :  { %617 = vmatpush.bf16.msrb.mxu1 %v806_v2 }
 0x37b   :  { %v875_v21 = vpop.eup %874 }
 0x37c   :  { %v462_v48 = vpop.xlane.xlu2 %461  ;;  %533 = vmatpush.bf16.msrb.mxu0 %v526_v45  ;;  %v877_v50 = vpop.eup %876  ;;  %v509_v53 = vmul.f32 %v875_v21, %v1117_v60 }
 0x37d   :  { %880 = vrcp.f32 %v462_v48  ;;  %v460_v14 = vpop.xlane.xlu1 %459  ;;  %v510_v55 = vmul.f32 %v877_v50, %v1109_v52  ;;  %v879_v57 = vpop.eup %878  ;;  %v91_v52 = vperm.slane %v1016_v56, 2 }
 0x37e   :  { %882 = vrcp.f32 %v460_v14  ;;  %v508_v62 = vmul.f32 %v879_v57, %v1119_v63  ;;  %618 = vmatpush.bf16.msrb.mxu1 %v805_v6 }
 0x37f   :  { %v524_v58 = vpack.c.bf16 %v510_v55, %v509_v53  ;;  %v259_v9 = vadd.f32 %v1028_v27, %v91_v52 }
 0x380   :  { %534 = vmatpush.bf16.msrb.mxu0 %v525_v51 }
 0x381   :  { %v521_v63 = vpack.c.bf16 %v259_v9, %v259_v9 }
 0x382   :  { %619 = vmatpush.bf16.msrb.mxu1 %v804_v10 }
 0x383   :  { %v881_v59 = vpop.eup %880 }
 0x384   :  { %v458_v61 = vpop.xlane.xlu2 %457  ;;  %535 = vmatpush.bf16.msrb.mxu0 %v524_v58  ;;  %v507_v46 = vmul.f32 %v881_v59, %v1124_v3  ;;  %v883_v5 = vpop.eup %882 }
 0x385   :  { %884 = vrcp.f32 %v458_v61  ;;  %v506_v0 = vmul.f32 %v883_v5, %v1126_v4 }
 0x386   :  { %v523_v60 = vpack.c.bf16 %v508_v62, %v507_v46 }
 0x388   :  { %536 = vmatpush.bf16.msrb.mxu0 %v523_v60 }
 0x38b   :  { %v885_v7 = vpop.eup %884 }
 0x38c   :  { %v505_v8 = vmul.f32 %v885_v7, %v1130_v1 }
 0x38e   :  { %v522_v3 = vpack.c.bf16 %v506_v0, %v505_v8 }
 0x390   :  { %537 = vmatpush.bf16.msrb.mxu0 %v522_v3 }
 0x393   :  { %538 = vmatmul.bf16.vlgmr.msrb.gmra.mxu0 %v521_v63 }
 0x410   :  { %v539_v11 = vpop.f32.mrf.mxu0 }
 0x411   :  { %v543_v12 = vpack.c.bf16 %v539_v11, %v539_v11 }
 0x413   :  { %620 = vmatmul.bf16.vlgmr.msrb.gmra.mxu1 %v543_v12 }
 0x418   :  { %v541_v56 = vpop.f32.mrf.mxu0 }
 0x490   :  { %v621_v27 = vpop.f32.mrf.mxu1 }
 0x491   :  { %v622_v4 = vadd.f32 %v821_v13, %v621_v27 }
 0x493   :  { %625 = vst [vmem:[#allocation7] sm:$0xff] %v622_v4 }
 0x494   :  { %636 = dma.vmem_to_hbm [thread:$0]  %s632_s10, 128, %s634_s13, [#allocation4]  }
 0x498   :  { %v623_v1 = vpop.f32.mrf.mxu1 }
 0x499   :  { %962 = dma.done.wait [#allocation4], 128  }
 0x49a   :  { %963 = vsyncadd [#allocation4], 4294967168 }
 0x49b   :  { %641 = vsyncpa [#allocation3], 1 }
 0x49c   :  { %642 = vsyncpa [#allocation6], 1 }
 0x49d   :  { %643 = vsyncpa [#allocation4], 1 }

</bundles_post_ra>
